<compile_context>
chip_gen: v7x
topology: tpu7x:2x2x1
jax: 0.10.0
libtpu: 0.0.40
codegen_flags: <defaults>
</compile_context>

<pallas_src>
import jax
import jax.numpy as jnp
from jax import lax
from jax.experimental import pallas as pl
from jax.experimental.pallas import tpu as pltpu


def _make_lstm_kernel(T, B, D, H):
    """Build the LSTM kernel for static (T, B, D, H).  Gate order: i, f, g, o."""
    H4 = 4 * H

    def kernel(x_ref, wih_ref, whh_ref, b_ref, out_ref, c_out_ref, gx_ref):
        # ---- Prologue: input projection for all time steps (independent of the
        # recurrence, so it sits entirely off the serial dependence chain).
        wih = wih_ref[...]                     # (D, 4H)
        bias = b_ref[...]                      # (1, 4H)
        for t in range(T):                     # T small static matmuls, aligned stores
            gx_ref[t] = (
                jnp.dot(x_ref[t].astype(jnp.float32), wih,
                        preferred_element_type=jnp.float32)
                + bias)

        whh = whh_ref[...]                     # (H, 4H), resident for the loop

        h = jnp.zeros((B, H), jnp.float32)
        c = jnp.zeros((B, H), jnp.float32)

        # ---- Recurrence, fully unrolled at trace time (T static).
        for t in range(T):
            gates = gx_ref[t] + jnp.dot(h, whh,
                                        preferred_element_type=jnp.float32)  # (B, 4H)

            # Full-width EUP activations, then static lane-band extraction.
            sig = jax.nn.sigmoid(gates)
            th = jnp.tanh(gates)
            i_g = sig[:, 0 * H:1 * H]
            f_g = sig[:, 1 * H:2 * H]
            o_g = sig[:, 3 * H:4 * H]
            g_g = th[:, 2 * H:3 * H]

            c = f_g * c + i_g * g_g
            h = o_g * jnp.tanh(c)
            out_ref[t] = h.astype(out_ref.dtype)

        c_out_ref[...] = c.astype(c_out_ref.dtype)

    return kernel


def prepare_params(w_ih, w_hh, b_ih, b_hh):
    """One-time parameter massaging; keep this out of the per-call hot path."""
    H4 = w_ih.shape[0]
    wih_t = jnp.transpose(w_ih)               # (D, 4H)
    whh_t = jnp.transpose(w_hh)               # (H, 4H)
    bias = (b_ih + b_hh).reshape(1, H4)       # (1, 4H)
    return wih_t, whh_t, bias


@jax.jit
def encoder_forward(x, wih_t, whh_t, bias):
    """x: (B, T, D) batch_first.  Returns (outputs, hidden, cell) like nn.LSTM."""
    B, T, D = x.shape
    H4 = wih_t.shape[1]
    H = H4 // 4

    x_tm = jnp.transpose(x, (1, 0, 2))         # (T, B, D) time-major

    out_tm, c_n = pl.pallas_call(
        _make_lstm_kernel(T, B, D, H),
        out_shape=(
            jax.ShapeDtypeStruct((T, B, H), x.dtype),     # h_t for every step
            jax.ShapeDtypeStruct((B, H), x.dtype),        # final cell state
        ),
        # Single invocation, everything whole-array resident in VMEM.
        scratch_shapes=[pltpu.VMEM((T, B, H4), jnp.float32)],  # gates_x slab
    )(x_tm, wih_t, whh_t, bias)

    outputs = jnp.transpose(out_tm, (1, 0, 2))             # (B, T, H) batch_first
    hidden = out_tm[-1][None]                               # (1, B, H) == h_T
    cell = c_n[None]                                        # (1, B, H)
    return outputs, hidden, cell


def reference_lstm(x, w_ih, w_hh, b_ih, b_hh):
    """Pure-JAX reference matching torch.nn.LSTM semantics (for validation)."""
    B, T, D = x.shape
    H = w_hh.shape[1]
    bias = b_ih + b_hh

    def step(carry, x_t):
        h, c = carry
        gates = x_t @ w_ih.T + h @ w_hh.T + bias
        i = jax.nn.sigmoid(gates[:, 0 * H:1 * H])
        f = jax.nn.sigmoid(gates[:, 1 * H:2 * H])
        g = jnp.tanh(gates[:, 2 * H:3 * H])
        o = jax.nn.sigmoid(gates[:, 3 * H:4 * H])
        c_new = f * c + i * g
        h_new = o * jnp.tanh(c_new)
        return (h_new, c_new), h_new

    h0 = jnp.zeros((B, H), x.dtype)
    c0 = jnp.zeros((B, H), x.dtype)
    (h_n, c_n), ys = lax.scan(step, (h0, c0), jnp.transpose(x, (1, 0, 2)))
    return jnp.transpose(ys, (1, 0, 2)), h_n[None], c_n[None]


if __name__ == "__main__":
    # Small shapes implied by the module: batch=2, seq=8, input_dim=4, hidden=32.
    B, T, D, H = 2, 8, 4, 32

    key = jax.random.PRNGKey(0)
    k_x, k1, k2, k3, k4 = jax.random.split(key, 5)

    # Deterministic parameter init (uniform(-1/sqrt(H), 1/sqrt(H)), like PyTorch).
    bound = 1.0 / jnp.sqrt(jnp.float32(H))
    w_ih = jax.random.uniform(k1, (4 * H, D), jnp.float32, -bound, bound)
    w_hh = jax.random.uniform(k2, (4 * H, H), jnp.float32, -bound, bound)
    b_ih = jax.random.uniform(k3, (4 * H,), jnp.float32, -bound, bound)
    b_hh = jax.random.uniform(k4, (4 * H,), jnp.float32, -bound, bound)

    x = jax.random.normal(k_x, (B, T, D), jnp.float32)

    # One-time parameter prep (outside the hot path), then the Pallas forward.
    wih_t, whh_t, bias = prepare_params(w_ih, w_hh, b_ih, b_hh)
    outputs, hidden, cell = encoder_forward(x, wih_t, whh_t, bias)
    jax.block_until_ready((outputs, hidden, cell))

    assert outputs.shape == (B, T, H)
    assert hidden.shape == (1, B, H)
    assert cell.shape == (1, B, H)

    ref_out, ref_h, ref_c = reference_lstm(x, w_ih, w_hh, b_ih, b_hh)
    assert jnp.allclose(outputs, ref_out, atol=1e-4, rtol=1e-4)
    assert jnp.allclose(hidden, ref_h, atol=1e-4, rtol=1e-4)
    assert jnp.allclose(cell, ref_c, atol=1e-4, rtol=1e-4)

    print("KERNEL_OK")
</pallas_src>

<mosaic_0001>
module attributes {stable_mosaic.version = 11 : i64} {
  func.func @kernel(%arg0: memref<8x2x4xf32, #tpu.memory_space<vmem>>, %arg1: memref<4x128xf32, #tpu.memory_space<vmem>>, %arg2: memref<32x128xf32, #tpu.memory_space<vmem>>, %arg3: memref<1x128xf32, #tpu.memory_space<vmem>>, %arg4: memref<8x2x32xf32, #tpu.memory_space<vmem>>, %arg5: memref<2x32xf32, #tpu.memory_space<vmem>>, %arg6: memref<8x2x128xf32, #tpu.memory_space<vmem>>) attributes {dimension_semantics = [], scalar_prefetch = 0 : i64, scratch_operands = 1 : i64, tpu.core_type = #tpu.core_type<tc>} {
    %c0 = arith.constant 0 : index
    %c0_0 = arith.constant 0 : index
    %0 = vector.load %arg1[%c0, %c0_0] : memref<4x128xf32, #tpu.memory_space<vmem>>, vector<4x128xf32>
    %c0_1 = arith.constant 0 : index
    %c0_2 = arith.constant 0 : index
    %1 = vector.load %arg3[%c0_1, %c0_2] : memref<1x128xf32, #tpu.memory_space<vmem>>, vector<1x128xf32>
    %c0_3 = arith.constant 0 : index
    %c0_4 = arith.constant 0 : index
    %c0_5 = arith.constant 0 : index
    %2 = vector.load %arg0[%c0_3, %c0_4, %c0_5] : memref<8x2x4xf32, #tpu.memory_space<vmem>>, vector<1x2x4xf32>
    %3 = vector.shape_cast %2 : vector<1x2x4xf32> to vector<2x4xf32>
    %cst = arith.constant dense<0.000000e+00> : vector<2x128xf32>
    %4 = tpu.matmul %3, %0, %cst {dimension_numbers = #tpu.dot_dimension_numbers<[1], [0], [0], [1], [0, 0, 1, 1], [], []>} : vector<2x4xf32>, vector<4x128xf32>, vector<2x128xf32> -> vector<2x128xf32>
    %5 = vector.broadcast %1 : vector<1x128xf32> to vector<2x128xf32>
    %6 = arith.addf %4, %5 : vector<2x128xf32>
    %c0_6 = arith.constant 0 : index
    %c0_7 = arith.constant 0 : index
    %c0_8 = arith.constant 0 : index
    %7 = vector.load %arg6[%c0_6, %c0_7, %c0_8] : memref<8x2x128xf32, #tpu.memory_space<vmem>>, vector<1x2x128xf32>
    %8 = vector.shape_cast %7 : vector<1x2x128xf32> to vector<2x128xf32>
    %9 = vector.shape_cast %6 : vector<2x128xf32> to vector<1x2x128xf32>
    tpu.vector_store %arg6[%c0_6, %c0_7, %c0_8], %9 {strides = array<i32>} : memref<8x2x128xf32, #tpu.memory_space<vmem>>, vector<1x2x128xf32>,
    %c1 = arith.constant 1 : index
    %c0_9 = arith.constant 0 : index
    %c0_10 = arith.constant 0 : index
    %10 = vector.load %arg0[%c1, %c0_9, %c0_10] : memref<8x2x4xf32, #tpu.memory_space<vmem>>, vector<1x2x4xf32>
    %11 = vector.shape_cast %10 : vector<1x2x4xf32> to vector<2x4xf32>
    %cst_11 = arith.constant dense<0.000000e+00> : vector<2x128xf32>
    %12 = tpu.matmul %11, %0, %cst_11 {dimension_numbers = #tpu.dot_dimension_numbers<[1], [0], [0], [1], [0, 0, 1, 1], [], []>} : vector<2x4xf32>, vector<4x128xf32>, vector<2x128xf32> -> vector<2x128xf32>
    %13 = vector.broadcast %1 : vector<1x128xf32> to vector<2x128xf32>
    %14 = arith.addf %12, %13 : vector<2x128xf32>
    %c1_12 = arith.constant 1 : index
    %c0_13 = arith.constant 0 : index
    %c0_14 = arith.constant 0 : index
    %15 = vector.load %arg6[%c1_12, %c0_13, %c0_14] : memref<8x2x128xf32, #tpu.memory_space<vmem>>, vector<1x2x128xf32>
    %16 = vector.shape_cast %15 : vector<1x2x128xf32> to vector<2x128xf32>
    %17 = vector.shape_cast %14 : vector<2x128xf32> to vector<1x2x128xf32>
    tpu.vector_store %arg6[%c1_12, %c0_13, %c0_14], %17 {strides = array<i32>} : memref<8x2x128xf32, #tpu.memory_space<vmem>>, vector<1x2x128xf32>,
    %c2 = arith.constant 2 : index
    %c0_15 = arith.constant 0 : index
    %c0_16 = arith.constant 0 : index
    %18 = vector.load %arg0[%c2, %c0_15, %c0_16] : memref<8x2x4xf32, #tpu.memory_space<vmem>>, vector<1x2x4xf32>
    %19 = vector.shape_cast %18 : vector<1x2x4xf32> to vector<2x4xf32>
    %cst_17 = arith.constant dense<0.000000e+00> : vector<2x128xf32>
    %20 = tpu.matmul %19, %0, %cst_17 {dimension_numbers = #tpu.dot_dimension_numbers<[1], [0], [0], [1], [0, 0, 1, 1], [], []>} : vector<2x4xf32>, vector<4x128xf32>, vector<2x128xf32> -> vector<2x128xf32>
    %21 = vector.broadcast %1 : vector<1x128xf32> to vector<2x128xf32>
    %22 = arith.addf %20, %21 : vector<2x128xf32>
    %c2_18 = arith.constant 2 : index
    %c0_19 = arith.constant 0 : index
    %c0_20 = arith.constant 0 : index
    %23 = vector.load %arg6[%c2_18, %c0_19, %c0_20] : memref<8x2x128xf32, #tpu.memory_space<vmem>>, vector<1x2x128xf32>
    %24 = vector.shape_cast %23 : vector<1x2x128xf32> to vector<2x128xf32>
    %25 = vector.shape_cast %22 : vector<2x128xf32> to vector<1x2x128xf32>
    tpu.vector_store %arg6[%c2_18, %c0_19, %c0_20], %25 {strides = array<i32>} : memref<8x2x128xf32, #tpu.memory_space<vmem>>, vector<1x2x128xf32>,
    %c3 = arith.constant 3 : index
    %c0_21 = arith.constant 0 : index
    %c0_22 = arith.constant 0 : index
    %26 = vector.load %arg0[%c3, %c0_21, %c0_22] : memref<8x2x4xf32, #tpu.memory_space<vmem>>, vector<1x2x4xf32>
    %27 = vector.shape_cast %26 : vector<1x2x4xf32> to vector<2x4xf32>
    %cst_23 = arith.constant dense<0.000000e+00> : vector<2x128xf32>
    %28 = tpu.matmul %27, %0, %cst_23 {dimension_numbers = #tpu.dot_dimension_numbers<[1], [0], [0], [1], [0, 0, 1, 1], [], []>} : vector<2x4xf32>, vector<4x128xf32>, vector<2x128xf32> -> vector<2x128xf32>
    %29 = vector.broadcast %1 : vector<1x128xf32> to vector<2x128xf32>
    %30 = arith.addf %28, %29 : vector<2x128xf32>
    %c3_24 = arith.constant 3 : index
    %c0_25 = arith.constant 0 : index
    %c0_26 = arith.constant 0 : index
    %31 = vector.load %arg6[%c3_24, %c0_25, %c0_26] : memref<8x2x128xf32, #tpu.memory_space<vmem>>, vector<1x2x128xf32>
    %32 = vector.shape_cast %31 : vector<1x2x128xf32> to vector<2x128xf32>
    %33 = vector.shape_cast %30 : vector<2x128xf32> to vector<1x2x128xf32>
    tpu.vector_store %arg6[%c3_24, %c0_25, %c0_26], %33 {strides = array<i32>} : memref<8x2x128xf32, #tpu.memory_space<vmem>>, vector<1x2x128xf32>,
    %c4 = arith.constant 4 : index
    %c0_27 = arith.constant 0 : index
    %c0_28 = arith.constant 0 : index
    %34 = vector.load %arg0[%c4, %c0_27, %c0_28] : memref<8x2x4xf32, #tpu.memory_space<vmem>>, vector<1x2x4xf32>
    %35 = vector.shape_cast %34 : vector<1x2x4xf32> to vector<2x4xf32>
    %cst_29 = arith.constant dense<0.000000e+00> : vector<2x128xf32>
    %36 = tpu.matmul %35, %0, %cst_29 {dimension_numbers = #tpu.dot_dimension_numbers<[1], [0], [0], [1], [0, 0, 1, 1], [], []>} : vector<2x4xf32>, vector<4x128xf32>, vector<2x128xf32> -> vector<2x128xf32>
    %37 = vector.broadcast %1 : vector<1x128xf32> to vector<2x128xf32>
    %38 = arith.addf %36, %37 : vector<2x128xf32>
    %c4_30 = arith.constant 4 : index
    %c0_31 = arith.constant 0 : index
    %c0_32 = arith.constant 0 : index
    %39 = vector.load %arg6[%c4_30, %c0_31, %c0_32] : memref<8x2x128xf32, #tpu.memory_space<vmem>>, vector<1x2x128xf32>
    %40 = vector.shape_cast %39 : vector<1x2x128xf32> to vector<2x128xf32>
    %41 = vector.shape_cast %38 : vector<2x128xf32> to vector<1x2x128xf32>
    tpu.vector_store %arg6[%c4_30, %c0_31, %c0_32], %41 {strides = array<i32>} : memref<8x2x128xf32, #tpu.memory_space<vmem>>, vector<1x2x128xf32>,
    %c5 = arith.constant 5 : index
    %c0_33 = arith.constant 0 : index
    %c0_34 = arith.constant 0 : index
    %42 = vector.load %arg0[%c5, %c0_33, %c0_34] : memref<8x2x4xf32, #tpu.memory_space<vmem>>, vector<1x2x4xf32>
    %43 = vector.shape_cast %42 : vector<1x2x4xf32> to vector<2x4xf32>
    %cst_35 = arith.constant dense<0.000000e+00> : vector<2x128xf32>
    %44 = tpu.matmul %43, %0, %cst_35 {dimension_numbers = #tpu.dot_dimension_numbers<[1], [0], [0], [1], [0, 0, 1, 1], [], []>} : vector<2x4xf32>, vector<4x128xf32>, vector<2x128xf32> -> vector<2x128xf32>
    %45 = vector.broadcast %1 : vector<1x128xf32> to vector<2x128xf32>
    %46 = arith.addf %44, %45 : vector<2x128xf32>
    %c5_36 = arith.constant 5 : index
    %c0_37 = arith.constant 0 : index
    %c0_38 = arith.constant 0 : index
    %47 = vector.load %arg6[%c5_36, %c0_37, %c0_38] : memref<8x2x128xf32, #tpu.memory_space<vmem>>, vector<1x2x128xf32>
    %48 = vector.shape_cast %47 : vector<1x2x128xf32> to vector<2x128xf32>
    %49 = vector.shape_cast %46 : vector<2x128xf32> to vector<1x2x128xf32>
    tpu.vector_store %arg6[%c5_36, %c0_37, %c0_38], %49 {strides = array<i32>} : memref<8x2x128xf32, #tpu.memory_space<vmem>>, vector<1x2x128xf32>,
    %c6 = arith.constant 6 : index
    %c0_39 = arith.constant 0 : index
    %c0_40 = arith.constant 0 : index
    %50 = vector.load %arg0[%c6, %c0_39, %c0_40] : memref<8x2x4xf32, #tpu.memory_space<vmem>>, vector<1x2x4xf32>
    %51 = vector.shape_cast %50 : vector<1x2x4xf32> to vector<2x4xf32>
    %cst_41 = arith.constant dense<0.000000e+00> : vector<2x128xf32>
    %52 = tpu.matmul %51, %0, %cst_41 {dimension_numbers = #tpu.dot_dimension_numbers<[1], [0], [0], [1], [0, 0, 1, 1], [], []>} : vector<2x4xf32>, vector<4x128xf32>, vector<2x128xf32> -> vector<2x128xf32>
    %53 = vector.broadcast %1 : vector<1x128xf32> to vector<2x128xf32>
    %54 = arith.addf %52, %53 : vector<2x128xf32>
    %c6_42 = arith.constant 6 : index
    %c0_43 = arith.constant 0 : index
    %c0_44 = arith.constant 0 : index
    %55 = vector.load %arg6[%c6_42, %c0_43, %c0_44] : memref<8x2x128xf32, #tpu.memory_space<vmem>>, vector<1x2x128xf32>
    %56 = vector.shape_cast %55 : vector<1x2x128xf32> to vector<2x128xf32>
    %57 = vector.shape_cast %54 : vector<2x128xf32> to vector<1x2x128xf32>
    tpu.vector_store %arg6[%c6_42, %c0_43, %c0_44], %57 {strides = array<i32>} : memref<8x2x128xf32, #tpu.memory_space<vmem>>, vector<1x2x128xf32>,
    %c7 = arith.constant 7 : index
    %c0_45 = arith.constant 0 : index
    %c0_46 = arith.constant 0 : index
    %58 = vector.load %arg0[%c7, %c0_45, %c0_46] : memref<8x2x4xf32, #tpu.memory_space<vmem>>, vector<1x2x4xf32>
    %59 = vector.shape_cast %58 : vector<1x2x4xf32> to vector<2x4xf32>
    %cst_47 = arith.constant dense<0.000000e+00> : vector<2x128xf32>
    %60 = tpu.matmul %59, %0, %cst_47 {dimension_numbers = #tpu.dot_dimension_numbers<[1], [0], [0], [1], [0, 0, 1, 1], [], []>} : vector<2x4xf32>, vector<4x128xf32>, vector<2x128xf32> -> vector<2x128xf32>
    %61 = vector.broadcast %1 : vector<1x128xf32> to vector<2x128xf32>
    %62 = arith.addf %60, %61 : vector<2x128xf32>
    %c7_48 = arith.constant 7 : index
    %c0_49 = arith.constant 0 : index
    %c0_50 = arith.constant 0 : index
    %63 = vector.load %arg6[%c7_48, %c0_49, %c0_50] : memref<8x2x128xf32, #tpu.memory_space<vmem>>, vector<1x2x128xf32>
    %64 = vector.shape_cast %63 : vector<1x2x128xf32> to vector<2x128xf32>
    %65 = vector.shape_cast %62 : vector<2x128xf32> to vector<1x2x128xf32>
    tpu.vector_store %arg6[%c7_48, %c0_49, %c0_50], %65 {strides = array<i32>} : memref<8x2x128xf32, #tpu.memory_space<vmem>>, vector<1x2x128xf32>,
    %c0_51 = arith.constant 0 : index
    %c0_52 = arith.constant 0 : index
    %66 = vector.load %arg2[%c0_51, %c0_52] : memref<32x128xf32, #tpu.memory_space<vmem>>, vector<32x128xf32>
    %cst_53 = arith.constant 0.000000e+00 : f32
    %67 = vector.broadcast %cst_53 : f32 to vector<2x32xf32>
    %cst_54 = arith.constant 0.000000e+00 : f32
    %68 = vector.broadcast %cst_54 : f32 to vector<2x32xf32>
    %c0_55 = arith.constant 0 : index
    %c0_56 = arith.constant 0 : index
    %c0_57 = arith.constant 0 : index
    %69 = vector.load %arg6[%c0_55, %c0_56, %c0_57] : memref<8x2x128xf32, #tpu.memory_space<vmem>>, vector<1x2x128xf32>
    %70 = vector.shape_cast %69 : vector<1x2x128xf32> to vector<2x128xf32>
    %cst_58 = arith.constant dense<0.000000e+00> : vector<2x128xf32>
    %71 = tpu.matmul %67, %66, %cst_58 {dimension_numbers = #tpu.dot_dimension_numbers<[1], [0], [0], [1], [0, 0, 1, 1], [], []>} : vector<2x32xf32>, vector<32x128xf32>, vector<2x128xf32> -> vector<2x128xf32>
    %72 = arith.addf %70, %71 : vector<2x128xf32>
    %73 = arith.negf %72 : vector<2x128xf32>
    %74 = math.exp %73 : vector<2x128xf32>
    %cst_59 = arith.constant 1.000000e+00 : f32
    %75 = vector.broadcast %cst_59 : f32 to vector<2x128xf32>
    %76 = arith.addf %75, %74 : vector<2x128xf32>
    %77 = arith.divf %75, %76 : vector<2x128xf32>
    %78 = math.tanh %72 : vector<2x128xf32>
    %79 = vector.extract_strided_slice %77 {offsets = [0, 0], sizes = [2, 32], strides = [1, 1]} : vector<2x128xf32> to vector<2x32xf32>
    %80 = vector.extract_strided_slice %77 {offsets = [0, 32], sizes = [2, 32], strides = [1, 1]} : vector<2x128xf32> to vector<2x32xf32>
    %81 = vector.extract_strided_slice %77 {offsets = [0, 96], sizes = [2, 32], strides = [1, 1]} : vector<2x128xf32> to vector<2x32xf32>
    %82 = vector.extract_strided_slice %78 {offsets = [0, 64], sizes = [2, 32], strides = [1, 1]} : vector<2x128xf32> to vector<2x32xf32>
    %83 = arith.mulf %80, %68 : vector<2x32xf32>
    %84 = arith.mulf %79, %82 : vector<2x32xf32>
    %85 = arith.addf %83, %84 : vector<2x32xf32>
    %86 = math.tanh %85 : vector<2x32xf32>
    %87 = arith.mulf %81, %86 : vector<2x32xf32>
    %c0_60 = arith.constant 0 : index
    %c0_61 = arith.constant 0 : index
    %c0_62 = arith.constant 0 : index
    %88 = vector.load %arg4[%c0_60, %c0_61, %c0_62] : memref<8x2x32xf32, #tpu.memory_space<vmem>>, vector<1x2x32xf32>
    %89 = vector.shape_cast %88 : vector<1x2x32xf32> to vector<2x32xf32>
    %90 = vector.shape_cast %87 : vector<2x32xf32> to vector<1x2x32xf32>
    tpu.vector_store %arg4[%c0_60, %c0_61, %c0_62], %90 {strides = array<i32>} : memref<8x2x32xf32, #tpu.memory_space<vmem>>, vector<1x2x32xf32>,
    %c1_63 = arith.constant 1 : index
    %c0_64 = arith.constant 0 : index
    %c0_65 = arith.constant 0 : index
    %91 = vector.load %arg6[%c1_63, %c0_64, %c0_65] : memref<8x2x128xf32, #tpu.memory_space<vmem>>, vector<1x2x128xf32>
    %92 = vector.shape_cast %91 : vector<1x2x128xf32> to vector<2x128xf32>
    %cst_66 = arith.constant dense<0.000000e+00> : vector<2x128xf32>
    %93 = tpu.matmul %87, %66, %cst_66 {dimension_numbers = #tpu.dot_dimension_numbers<[1], [0], [0], [1], [0, 0, 1, 1], [], []>} : vector<2x32xf32>, vector<32x128xf32>, vector<2x128xf32> -> vector<2x128xf32>
    %94 = arith.addf %92, %93 : vector<2x128xf32>
    %95 = arith.negf %94 : vector<2x128xf32>
    %96 = math.exp %95 : vector<2x128xf32>
    %cst_67 = arith.constant 1.000000e+00 : f32
    %97 = vector.broadcast %cst_67 : f32 to vector<2x128xf32>
    %98 = arith.addf %97, %96 : vector<2x128xf32>
    %99 = arith.divf %97, %98 : vector<2x128xf32>
    %100 = math.tanh %94 : vector<2x128xf32>
    %101 = vector.extract_strided_slice %99 {offsets = [0, 0], sizes = [2, 32], strides = [1, 1]} : vector<2x128xf32> to vector<2x32xf32>
    %102 = vector.extract_strided_slice %99 {offsets = [0, 32], sizes = [2, 32], strides = [1, 1]} : vector<2x128xf32> to vector<2x32xf32>
    %103 = vector.extract_strided_slice %99 {offsets = [0, 96], sizes = [2, 32], strides = [1, 1]} : vector<2x128xf32> to vector<2x32xf32>
    %104 = vector.extract_strided_slice %100 {offsets = [0, 64], sizes = [2, 32], strides = [1, 1]} : vector<2x128xf32> to vector<2x32xf32>
    %105 = arith.mulf %102, %85 : vector<2x32xf32>
    %106 = arith.mulf %101, %104 : vector<2x32xf32>
    %107 = arith.addf %105, %106 : vector<2x32xf32>
    %108 = math.tanh %107 : vector<2x32xf32>
    %109 = arith.mulf %103, %108 : vector<2x32xf32>
    %c1_68 = arith.constant 1 : index
    %c0_69 = arith.constant 0 : index
    %c0_70 = arith.constant 0 : index
    %110 = vector.load %arg4[%c1_68, %c0_69, %c0_70] : memref<8x2x32xf32, #tpu.memory_space<vmem>>, vector<1x2x32xf32>
    %111 = vector.shape_cast %110 : vector<1x2x32xf32> to vector<2x32xf32>
    %112 = vector.shape_cast %109 : vector<2x32xf32> to vector<1x2x32xf32>
    tpu.vector_store %arg4[%c1_68, %c0_69, %c0_70], %112 {strides = array<i32>} : memref<8x2x32xf32, #tpu.memory_space<vmem>>, vector<1x2x32xf32>,
    %c2_71 = arith.constant 2 : index
    %c0_72 = arith.constant 0 : index
    %c0_73 = arith.constant 0 : index
    %113 = vector.load %arg6[%c2_71, %c0_72, %c0_73] : memref<8x2x128xf32, #tpu.memory_space<vmem>>, vector<1x2x128xf32>
    %114 = vector.shape_cast %113 : vector<1x2x128xf32> to vector<2x128xf32>
    %cst_74 = arith.constant dense<0.000000e+00> : vector<2x128xf32>
    %115 = tpu.matmul %109, %66, %cst_74 {dimension_numbers = #tpu.dot_dimension_numbers<[1], [0], [0], [1], [0, 0, 1, 1], [], []>} : vector<2x32xf32>, vector<32x128xf32>, vector<2x128xf32> -> vector<2x128xf32>
    %116 = arith.addf %114, %115 : vector<2x128xf32>
    %117 = arith.negf %116 : vector<2x128xf32>
    %118 = math.exp %117 : vector<2x128xf32>
    %cst_75 = arith.constant 1.000000e+00 : f32
    %119 = vector.broadcast %cst_75 : f32 to vector<2x128xf32>
    %120 = arith.addf %119, %118 : vector<2x128xf32>
    %121 = arith.divf %119, %120 : vector<2x128xf32>
    %122 = math.tanh %116 : vector<2x128xf32>
    %123 = vector.extract_strided_slice %121 {offsets = [0, 0], sizes = [2, 32], strides = [1, 1]} : vector<2x128xf32> to vector<2x32xf32>
    %124 = vector.extract_strided_slice %121 {offsets = [0, 32], sizes = [2, 32], strides = [1, 1]} : vector<2x128xf32> to vector<2x32xf32>
    %125 = vector.extract_strided_slice %121 {offsets = [0, 96], sizes = [2, 32], strides = [1, 1]} : vector<2x128xf32> to vector<2x32xf32>
    %126 = vector.extract_strided_slice %122 {offsets = [0, 64], sizes = [2, 32], strides = [1, 1]} : vector<2x128xf32> to vector<2x32xf32>
    %127 = arith.mulf %124, %107 : vector<2x32xf32>
    %128 = arith.mulf %123, %126 : vector<2x32xf32>
    %129 = arith.addf %127, %128 : vector<2x32xf32>
    %130 = math.tanh %129 : vector<2x32xf32>
    %131 = arith.mulf %125, %130 : vector<2x32xf32>
    %c2_76 = arith.constant 2 : index
    %c0_77 = arith.constant 0 : index
    %c0_78 = arith.constant 0 : index
    %132 = vector.load %arg4[%c2_76, %c0_77, %c0_78] : memref<8x2x32xf32, #tpu.memory_space<vmem>>, vector<1x2x32xf32>
    %133 = vector.shape_cast %132 : vector<1x2x32xf32> to vector<2x32xf32>
    %134 = vector.shape_cast %131 : vector<2x32xf32> to vector<1x2x32xf32>
    tpu.vector_store %arg4[%c2_76, %c0_77, %c0_78], %134 {strides = array<i32>} : memref<8x2x32xf32, #tpu.memory_space<vmem>>, vector<1x2x32xf32>,
    %c3_79 = arith.constant 3 : index
    %c0_80 = arith.constant 0 : index
    %c0_81 = arith.constant 0 : index
    %135 = vector.load %arg6[%c3_79, %c0_80, %c0_81] : memref<8x2x128xf32, #tpu.memory_space<vmem>>, vector<1x2x128xf32>
    %136 = vector.shape_cast %135 : vector<1x2x128xf32> to vector<2x128xf32>
    %cst_82 = arith.constant dense<0.000000e+00> : vector<2x128xf32>
    %137 = tpu.matmul %131, %66, %cst_82 {dimension_numbers = #tpu.dot_dimension_numbers<[1], [0], [0], [1], [0, 0, 1, 1], [], []>} : vector<2x32xf32>, vector<32x128xf32>, vector<2x128xf32> -> vector<2x128xf32>
    %138 = arith.addf %136, %137 : vector<2x128xf32>
    %139 = arith.negf %138 : vector<2x128xf32>
    %140 = math.exp %139 : vector<2x128xf32>
    %cst_83 = arith.constant 1.000000e+00 : f32
    %141 = vector.broadcast %cst_83 : f32 to vector<2x128xf32>
    %142 = arith.addf %141, %140 : vector<2x128xf32>
    %143 = arith.divf %141, %142 : vector<2x128xf32>
    %144 = math.tanh %138 : vector<2x128xf32>
    %145 = vector.extract_strided_slice %143 {offsets = [0, 0], sizes = [2, 32], strides = [1, 1]} : vector<2x128xf32> to vector<2x32xf32>
    %146 = vector.extract_strided_slice %143 {offsets = [0, 32], sizes = [2, 32], strides = [1, 1]} : vector<2x128xf32> to vector<2x32xf32>
    %147 = vector.extract_strided_slice %143 {offsets = [0, 96], sizes = [2, 32], strides = [1, 1]} : vector<2x128xf32> to vector<2x32xf32>
    %148 = vector.extract_strided_slice %144 {offsets = [0, 64], sizes = [2, 32], strides = [1, 1]} : vector<2x128xf32> to vector<2x32xf32>
    %149 = arith.mulf %146, %129 : vector<2x32xf32>
    %150 = arith.mulf %145, %148 : vector<2x32xf32>
    %151 = arith.addf %149, %150 : vector<2x32xf32>
    %152 = math.tanh %151 : vector<2x32xf32>
    %153 = arith.mulf %147, %152 : vector<2x32xf32>
    %c3_84 = arith.constant 3 : index
    %c0_85 = arith.constant 0 : index
    %c0_86 = arith.constant 0 : index
    %154 = vector.load %arg4[%c3_84, %c0_85, %c0_86] : memref<8x2x32xf32, #tpu.memory_space<vmem>>, vector<1x2x32xf32>
    %155 = vector.shape_cast %154 : vector<1x2x32xf32> to vector<2x32xf32>
    %156 = vector.shape_cast %153 : vector<2x32xf32> to vector<1x2x32xf32>
    tpu.vector_store %arg4[%c3_84, %c0_85, %c0_86], %156 {strides = array<i32>} : memref<8x2x32xf32, #tpu.memory_space<vmem>>, vector<1x2x32xf32>,
    %c4_87 = arith.constant 4 : index
    %c0_88 = arith.constant 0 : index
    %c0_89 = arith.constant 0 : index
    %157 = vector.load %arg6[%c4_87, %c0_88, %c0_89] : memref<8x2x128xf32, #tpu.memory_space<vmem>>, vector<1x2x128xf32>
    %158 = vector.shape_cast %157 : vector<1x2x128xf32> to vector<2x128xf32>
    %cst_90 = arith.constant dense<0.000000e+00> : vector<2x128xf32>
    %159 = tpu.matmul %153, %66, %cst_90 {dimension_numbers = #tpu.dot_dimension_numbers<[1], [0], [0], [1], [0, 0, 1, 1], [], []>} : vector<2x32xf32>, vector<32x128xf32>, vector<2x128xf32> -> vector<2x128xf32>
    %160 = arith.addf %158, %159 : vector<2x128xf32>
    %161 = arith.negf %160 : vector<2x128xf32>
    %162 = math.exp %161 : vector<2x128xf32>
    %cst_91 = arith.constant 1.000000e+00 : f32
    %163 = vector.broadcast %cst_91 : f32 to vector<2x128xf32>
    %164 = arith.addf %163, %162 : vector<2x128xf32>
    %165 = arith.divf %163, %164 : vector<2x128xf32>
    %166 = math.tanh %160 : vector<2x128xf32>
    %167 = vector.extract_strided_slice %165 {offsets = [0, 0], sizes = [2, 32], strides = [1, 1]} : vector<2x128xf32> to vector<2x32xf32>
    %168 = vector.extract_strided_slice %165 {offsets = [0, 32], sizes = [2, 32], strides = [1, 1]} : vector<2x128xf32> to vector<2x32xf32>
    %169 = vector.extract_strided_slice %165 {offsets = [0, 96], sizes = [2, 32], strides = [1, 1]} : vector<2x128xf32> to vector<2x32xf32>
    %170 = vector.extract_strided_slice %166 {offsets = [0, 64], sizes = [2, 32], strides = [1, 1]} : vector<2x128xf32> to vector<2x32xf32>
    %171 = arith.mulf %168, %151 : vector<2x32xf32>
    %172 = arith.mulf %167, %170 : vector<2x32xf32>
    %173 = arith.addf %171, %172 : vector<2x32xf32>
    %174 = math.tanh %173 : vector<2x32xf32>
    %175 = arith.mulf %169, %174 : vector<2x32xf32>
    %c4_92 = arith.constant 4 : index
    %c0_93 = arith.constant 0 : index
    %c0_94 = arith.constant 0 : index
    %176 = vector.load %arg4[%c4_92, %c0_93, %c0_94] : memref<8x2x32xf32, #tpu.memory_space<vmem>>, vector<1x2x32xf32>
    %177 = vector.shape_cast %176 : vector<1x2x32xf32> to vector<2x32xf32>
    %178 = vector.shape_cast %175 : vector<2x32xf32> to vector<1x2x32xf32>
    tpu.vector_store %arg4[%c4_92, %c0_93, %c0_94], %178 {strides = array<i32>} : memref<8x2x32xf32, #tpu.memory_space<vmem>>, vector<1x2x32xf32>,
    %c5_95 = arith.constant 5 : index
    %c0_96 = arith.constant 0 : index
    %c0_97 = arith.constant 0 : index
    %179 = vector.load %arg6[%c5_95, %c0_96, %c0_97] : memref<8x2x128xf32, #tpu.memory_space<vmem>>, vector<1x2x128xf32>
    %180 = vector.shape_cast %179 : vector<1x2x128xf32> to vector<2x128xf32>
    %cst_98 = arith.constant dense<0.000000e+00> : vector<2x128xf32>
    %181 = tpu.matmul %175, %66, %cst_98 {dimension_numbers = #tpu.dot_dimension_numbers<[1], [0], [0], [1], [0, 0, 1, 1], [], []>} : vector<2x32xf32>, vector<32x128xf32>, vector<2x128xf32> -> vector<2x128xf32>
    %182 = arith.addf %180, %181 : vector<2x128xf32>
    %183 = arith.negf %182 : vector<2x128xf32>
    %184 = math.exp %183 : vector<2x128xf32>
    %cst_99 = arith.constant 1.000000e+00 : f32
    %185 = vector.broadcast %cst_99 : f32 to vector<2x128xf32>
    %186 = arith.addf %185, %184 : vector<2x128xf32>
    %187 = arith.divf %185, %186 : vector<2x128xf32>
    %188 = math.tanh %182 : vector<2x128xf32>
    %189 = vector.extract_strided_slice %187 {offsets = [0, 0], sizes = [2, 32], strides = [1, 1]} : vector<2x128xf32> to vector<2x32xf32>
    %190 = vector.extract_strided_slice %187 {offsets = [0, 32], sizes = [2, 32], strides = [1, 1]} : vector<2x128xf32> to vector<2x32xf32>
    %191 = vector.extract_strided_slice %187 {offsets = [0, 96], sizes = [2, 32], strides = [1, 1]} : vector<2x128xf32> to vector<2x32xf32>
    %192 = vector.extract_strided_slice %188 {offsets = [0, 64], sizes = [2, 32], strides = [1, 1]} : vector<2x128xf32> to vector<2x32xf32>
    %193 = arith.mulf %190, %173 : vector<2x32xf32>
    %194 = arith.mulf %189, %192 : vector<2x32xf32>
    %195 = arith.addf %193, %194 : vector<2x32xf32>
    %196 = math.tanh %195 : vector<2x32xf32>
    %197 = arith.mulf %191, %196 : vector<2x32xf32>
    %c5_100 = arith.constant 5 : index
    %c0_101 = arith.constant 0 : index
    %c0_102 = arith.constant 0 : index
    %198 = vector.load %arg4[%c5_100, %c0_101, %c0_102] : memref<8x2x32xf32, #tpu.memory_space<vmem>>, vector<1x2x32xf32>
    %199 = vector.shape_cast %198 : vector<1x2x32xf32> to vector<2x32xf32>
    %200 = vector.shape_cast %197 : vector<2x32xf32> to vector<1x2x32xf32>
    tpu.vector_store %arg4[%c5_100, %c0_101, %c0_102], %200 {strides = array<i32>} : memref<8x2x32xf32, #tpu.memory_space<vmem>>, vector<1x2x32xf32>,
    %c6_103 = arith.constant 6 : index
    %c0_104 = arith.constant 0 : index
    %c0_105 = arith.constant 0 : index
    %201 = vector.load %arg6[%c6_103, %c0_104, %c0_105] : memref<8x2x128xf32, #tpu.memory_space<vmem>>, vector<1x2x128xf32>
    %202 = vector.shape_cast %201 : vector<1x2x128xf32> to vector<2x128xf32>
    %cst_106 = arith.constant dense<0.000000e+00> : vector<2x128xf32>
    %203 = tpu.matmul %197, %66, %cst_106 {dimension_numbers = #tpu.dot_dimension_numbers<[1], [0], [0], [1], [0, 0, 1, 1], [], []>} : vector<2x32xf32>, vector<32x128xf32>, vector<2x128xf32> -> vector<2x128xf32>
    %204 = arith.addf %202, %203 : vector<2x128xf32>
    %205 = arith.negf %204 : vector<2x128xf32>
    %206 = math.exp %205 : vector<2x128xf32>
    %cst_107 = arith.constant 1.000000e+00 : f32
    %207 = vector.broadcast %cst_107 : f32 to vector<2x128xf32>
    %208 = arith.addf %207, %206 : vector<2x128xf32>
    %209 = arith.divf %207, %208 : vector<2x128xf32>
    %210 = math.tanh %204 : vector<2x128xf32>
    %211 = vector.extract_strided_slice %209 {offsets = [0, 0], sizes = [2, 32], strides = [1, 1]} : vector<2x128xf32> to vector<2x32xf32>
    %212 = vector.extract_strided_slice %209 {offsets = [0, 32], sizes = [2, 32], strides = [1, 1]} : vector<2x128xf32> to vector<2x32xf32>
    %213 = vector.extract_strided_slice %209 {offsets = [0, 96], sizes = [2, 32], strides = [1, 1]} : vector<2x128xf32> to vector<2x32xf32>
    %214 = vector.extract_strided_slice %210 {offsets = [0, 64], sizes = [2, 32], strides = [1, 1]} : vector<2x128xf32> to vector<2x32xf32>
    %215 = arith.mulf %212, %195 : vector<2x32xf32>
    %216 = arith.mulf %211, %214 : vector<2x32xf32>
    %217 = arith.addf %215, %216 : vector<2x32xf32>
    %218 = math.tanh %217 : vector<2x32xf32>
    %219 = arith.mulf %213, %218 : vector<2x32xf32>
    %c6_108 = arith.constant 6 : index
    %c0_109 = arith.constant 0 : index
    %c0_110 = arith.constant 0 : index
    %220 = vector.load %arg4[%c6_108, %c0_109, %c0_110] : memref<8x2x32xf32, #tpu.memory_space<vmem>>, vector<1x2x32xf32>
    %221 = vector.shape_cast %220 : vector<1x2x32xf32> to vector<2x32xf32>
    %222 = vector.shape_cast %219 : vector<2x32xf32> to vector<1x2x32xf32>
    tpu.vector_store %arg4[%c6_108, %c0_109, %c0_110], %222 {strides = array<i32>} : memref<8x2x32xf32, #tpu.memory_space<vmem>>, vector<1x2x32xf32>,
    %c7_111 = arith.constant 7 : index
    %c0_112 = arith.constant 0 : index
    %c0_113 = arith.constant 0 : index
    %223 = vector.load %arg6[%c7_111, %c0_112, %c0_113] : memref<8x2x128xf32, #tpu.memory_space<vmem>>, vector<1x2x128xf32>
    %224 = vector.shape_cast %223 : vector<1x2x128xf32> to vector<2x128xf32>
    %cst_114 = arith.constant dense<0.000000e+00> : vector<2x128xf32>
    %225 = tpu.matmul %219, %66, %cst_114 {dimension_numbers = #tpu.dot_dimension_numbers<[1], [0], [0], [1], [0, 0, 1, 1], [], []>} : vector<2x32xf32>, vector<32x128xf32>, vector<2x128xf32> -> vector<2x128xf32>
    %226 = arith.addf %224, %225 : vector<2x128xf32>
    %227 = arith.negf %226 : vector<2x128xf32>
    %228 = math.exp %227 : vector<2x128xf32>
    %cst_115 = arith.constant 1.000000e+00 : f32
    %229 = vector.broadcast %cst_115 : f32 to vector<2x128xf32>
    %230 = arith.addf %229, %228 : vector<2x128xf32>
    %231 = arith.divf %229, %230 : vector<2x128xf32>
    %232 = math.tanh %226 : vector<2x128xf32>
    %233 = vector.extract_strided_slice %231 {offsets = [0, 0], sizes = [2, 32], strides = [1, 1]} : vector<2x128xf32> to vector<2x32xf32>
    %234 = vector.extract_strided_slice %231 {offsets = [0, 32], sizes = [2, 32], strides = [1, 1]} : vector<2x128xf32> to vector<2x32xf32>
    %235 = vector.extract_strided_slice %231 {offsets = [0, 96], sizes = [2, 32], strides = [1, 1]} : vector<2x128xf32> to vector<2x32xf32>
    %236 = vector.extract_strided_slice %232 {offsets = [0, 64], sizes = [2, 32], strides = [1, 1]} : vector<2x128xf32> to vector<2x32xf32>
    %237 = arith.mulf %234, %217 : vector<2x32xf32>
    %238 = arith.mulf %233, %236 : vector<2x32xf32>
    %239 = arith.addf %237, %238 : vector<2x32xf32>
    %240 = math.tanh %239 : vector<2x32xf32>
    %241 = arith.mulf %235, %240 : vector<2x32xf32>
    %c7_116 = arith.constant 7 : index
    %c0_117 = arith.constant 0 : index
    %c0_118 = arith.constant 0 : index
    %242 = vector.load %arg4[%c7_116, %c0_117, %c0_118] : memref<8x2x32xf32, #tpu.memory_space<vmem>>, vector<1x2x32xf32>
    %243 = vector.shape_cast %242 : vector<1x2x32xf32> to vector<2x32xf32>
    %244 = vector.shape_cast %241 : vector<2x32xf32> to vector<1x2x32xf32>
    tpu.vector_store %arg4[%c7_116, %c0_117, %c0_118], %244 {strides = array<i32>} : memref<8x2x32xf32, #tpu.memory_space<vmem>>, vector<1x2x32xf32>,
    %c0_119 = arith.constant 0 : index
    %c0_120 = arith.constant 0 : index
    %245 = vector.load %arg5[%c0_119, %c0_120] : memref<2x32xf32, #tpu.memory_space<vmem>>, vector<2x32xf32>
    tpu.vector_store %arg5[%c0_119, %c0_120], %239 {strides = array<i32>} : memref<2x32xf32, #tpu.memory_space<vmem>>, vector<2x32xf32>,
    return
  }
}

</mosaic_0001>

<bundles_post_ra>
// kernel: encoder_forward.1
= control target key start
LH: loop header
LB: loop body
LE: loop exit
PB: predicated region body
PF: predicated region fallthrough
CT: control target
= control target key end

     0   :  { %11 = vsyncpa [#allocation4], 0  ;;  %s2209_s0 = inlined_call_operand.vmem [shape: f32[8,2,4], index: 0, kind: input, shape index: {}]   ;;  %s2210_s1 = inlined_call_operand.hbm [shape: f32[4,128], index: 1, kind: input, shape index: {}]   ;;  %s2211_s2 = inlined_call_operand.vmem [shape: f32[32,128], index: 2, kind: input, shape index: {}]   ;;  %s2212_s3 = inlined_call_operand.vmem [shape: f32[1,128], index: 3, kind: input, shape index: {}]   ;;  %s2213_s4 = inlined_call_operand.vmem [shape: f32[8,2,32], index: 4, kind: output, shape index: {0}]   ;;  %s2214_s5 = inlined_call_operand.hbm [shape: f32[2,32], index: 5, kind: output, shape index: {1}]  }
   0x1   :  { %12 = vsyncpa [#allocation5], 0  ;;  %s1919_s18 = smov [#allocation3]   ;;  %s1871_s22 = scalar_lea.hbm %s2210_s1, 64 }
   0x2   :  { %s21_s19 = sshll.u32 %s1919_s18, 4  ;;  %p1872_p0 = scmp.ne.s32.totalorder %s2210_s1, %s1871_s22  ;;  %s22_s19 = int_to_ptr.vmem [resolvable:$true] %s21_s19 }
   0x3   :  { %p1875_p1 = scmp.lt.u32.totalorder %s1871_s22, %s2210_s1 }
   0x5   :  { %p1877_p2 = pnand %p1875_p1, %p1872_p0 }
   0x7   :  { %1880 = shalt.err (!%p1877_p2)
}
   0x8   :  { %s1881_s27 = scalar_lea.vmem %s22_s19, 64  ;;  %p1886_p4 = scmp.lt.s32.totalorder %s22_s19, %s22_s19 }
   0x9   :  { %p1882_p3 = scmp.ne.s32.totalorder %s22_s19, %s1881_s27  ;;  %p1887_p5 = scmp.lt.s32.totalorder %s1881_s27, %s1881_s27 }
   0xb   :  { %p1888_p6 = por %p1887_p5, %p1886_p4 }
   0xd   :  { %p1889_p7 = pnand %p1888_p6, %p1882_p3 }
   0xf   :  { %1892 = shalt.err (!%p1889_p7)
}
  0x10   :  { %24 = dma.hbm_to_vmem [thread:$0]  %s2210_s1, 64, %s22_s19, [#allocation4]  }
  0x11   :  { %1915 = dma.done.wait [#allocation4], 64  }
  0x12   :  { %1916 = vsyncadd [#allocation4], 4294967232  ;;  %v1920_v0 = vmov 0.0   ;;  %vm1921_vm0 = vmmov 0   ;;  %vm45_vm1 = vcmask 1043456   ;;  %vm41_vm2 = vcmask 31744  }
  0x13   :  { %1623 = vmatprep.subr.mxu0 %v1920_v0  ;;  %1625 = vmatprep.mubr.msk.f32.mxu0 %vm1921_vm0, %v1920_v0  ;;  %v1975_v1 = vld [vmem:[#allocation3] sm:$0xf]  ;;  %v34_v2 = vld [vmem:[%s2209_s0] sm:$0x3]  ;;  %v1527_v3 = vld [vmem:[%s2209_s0 + $0x4] sm:$0x3] }
  0x14   :  { %1628 = vmatprep.subr.mxu1 %v1920_v0  ;;  %1630 = vmatprep.mubr.msk.f32.mxu1 %vm1921_vm0, %v1920_v0  ;;  %v1533_v4 = vld [vmem:[%s2209_s0 + $0x8] sm:$0x3]  ;;  %v659_v5 = vld [vmem:[%s2211_s2] sm:$0xff]  ;;  %v1539_v7 = vld [vmem:[%s2209_s0 + $0xc] sm:$0x3]  ;;  %v1922_v9 = vmov 0.0|0.0  }
  0x15   :  { %1624 = vmatpush3.msk.msra.mxu0 %vm45_vm1, %v1975_v1  ;;  %1629 = vmatpush3.msk.msra.mxu1 %vm45_vm1, %v1975_v1  ;;  %v660_v6 = vld [vmem:[%s2211_s2 + $0x8] sm:$0xff]  ;;  %v661_v10 = vld [vmem:[%s2211_s2 + $0x10] sm:$0xff]  ;;  %v662_v11 = vld [vmem:[%s2211_s2 + $0x18] sm:$0xff]  ;;  %s1924_s21 = smov 32   ;;  %vm767_vm3 = vcmask 254976   ;;  %vm664_vm4 = vcmask 261120  }
  0x16   :  { %1626 = vmatmul.mubr.msk.f32.vlgmr.msra.gmra.mrb[0].mxu0 %vm41_vm2, %v34_v2  ;;  %1633 = vmatprep.subr.mxu0 %v1920_v0  ;;  %v2018_v8 = vpack.c.bf16 %v660_v6, %v659_v5  ;;  %v2029_v12 = vpack.c.bf16 %v662_v11, %v661_v10  ;;  %v2046_v13 = vld [vmem:[%s2212_s3] ss:$0 sm:$0xff]  ;;  %s1923_s3 = smov 64   ;;  %v1524_v40 = vld [vmem:[%s2209_s0 + $0x2] sm:$0x3]  ;;  %s1925_s17 = smov 96  }
  0x17   :  { %1634 = vmatpush3.msk.msra.mxu0 %vm45_vm1, %v1975_v1  ;;  %1635 = vmatprep.mubr.msk.f32.mxu0 %vm1921_vm0, %v1920_v0  ;;  %v1530_v41 = vld [vmem:[%s2209_s0 + $0x6] sm:$0x3]  ;;  %v1536_v42 = vld [vmem:[%s2209_s0 + $0xa] sm:$0x3]  ;;  %v1542_v44 = vld [vmem:[%s2209_s0 + $0xe] sm:$0x3] }
  0x18   :  { %1643 = vmatprep.subr.mxu0 %v1920_v0  ;;  %1638 = vmatprep.subr.mxu1 %v1920_v0  ;;  %s1926_s18 = smov [#allocation6]  }
  0x19   :  { %1631 = vmatmul.mubr.msk.f32.vlgmr.msra.gmra.mrb[0].mxu1 %vm41_vm2, %v1524_v40  ;;  %s1510_s19 = sshll.u32 %s1926_s18, 4  ;;  %s1511_s19 = int_to_ptr.vmem [resolvable:$true] %s1510_s19 }
  0x1a   :  { %1636 = vmatmul.mubr.msk.f32.vlgmr.msra.gmra.mrb[2].mxu0 %vm41_vm2, %v1527_v3  ;;  %1639 = vmatpush3.msk.msra.mxu1 %vm45_vm1, %v1975_v1  ;;  %s1893_s2 = scalar_lea.vmem %s1511_s19, 32  ;;  %p1898_p9 = scmp.lt.s32.totalorder %s1511_s19, %s1511_s19 }
  0x1b   :  { %1644 = vmatpush3.msk.msra.mxu0 %vm45_vm1, %v1975_v1  ;;  %1645 = vmatprep.mubr.msk.f32.mxu0 %vm1921_vm0, %v1920_v0  ;;  %p1894_p8 = scmp.ne.s32.totalorder %s1511_s19, %s1893_s2  ;;  %p1899_p10 = scmp.lt.s32.totalorder %s1893_s2, %s1893_s2 }
  0x1c   :  { %1653 = vmatprep.subr.mxu0 %v1920_v0  ;;  %1640 = vmatprep.mubr.msk.f32.mxu1 %vm1921_vm0, %v1920_v0 }
  0x1d   :  { %1648 = vmatprep.subr.mxu1 %v1920_v0  ;;  %1641 = vmatmul.mubr.msk.f32.vlgmr.msra.gmra.mrb[2].mxu1 %vm41_vm2, %v1530_v41  ;;  %p1900_p11 = por %p1899_p10, %p1898_p9 }
  0x1e   :  { %1646 = vmatmul.mubr.msk.f32.vlgmr.msra.gmra.mrb[4].mxu0 %vm41_vm2, %v1533_v4  ;;  %1649 = vmatpush3.msk.msra.mxu1 %vm45_vm1, %v1975_v1 }
  0x1f   :  { %1654 = vmatpush3.msk.msra.mxu0 %vm45_vm1, %v1975_v1  ;;  %1655 = vmatprep.mubr.msk.f32.mxu0 %vm1921_vm0, %v1920_v0  ;;  %p1901_p12 = pnand %p1900_p11, %p1894_p8 }
  0x20   :  { %1751 = vmatprep.subr.bf16.mxu0 %v1922_v9  ;;  %1650 = vmatprep.mubr.msk.f32.mxu1 %vm1921_vm0, %v1920_v0 }
  0x21   :  { %1658 = vmatprep.subr.mxu1 %v1920_v0  ;;  %1651 = vmatmul.mubr.msk.f32.vlgmr.msra.gmra.mrb[4].mxu1 %vm41_vm2, %v1536_v42 }
  0x22   :  { %1656 = vmatmul.mubr.msk.f32.vlgmr.msra.gmra.mrb[6].mxu0 %vm41_vm2, %v1539_v7  ;;  %1659 = vmatpush3.msk.msra.mxu1 %vm45_vm1, %v1975_v1 }
  0x23   :  { %1753 = vmatpush3.bf16.msra.mxu0 %v2018_v8  ;;  %1671 = vmatprep.mubr.msk.f32.mxu0 %vm1921_vm0, %v1920_v0 }
  0x24   :  { %1754 = vmatprep.subr.bf16.mxu0 %v1922_v9  ;;  %1660 = vmatprep.mubr.msk.f32.mxu1 %vm1921_vm0, %v1920_v0 }
  0x25   :  { %1757 = vmatprep.subr.bf16.mxu1 %v1922_v9  ;;  %1661 = vmatmul.mubr.msk.f32.vlgmr.msra.gmra.mrb[6].mxu1 %vm41_vm2, %v1542_v44 }
  0x26   :  { %1759 = vmatpush3.bf16.msra.mxu1 %v2018_v8  ;;  %1682 = vmatprep.mubr.msk.f32.mxu1 %vm1921_vm0, %v1920_v0 }
  0x27   :  { %1756 = vmatpush3.bf16.msra.mxu0 %v2029_v12  ;;  %1760 = vmatprep.subr.bf16.mxu1 %v1922_v9 }
  0x28   :  { %1763 = vmatprep.subr.bf16.mxu0 %v1922_v9 }
  0x2a   :  { %1672 = vmatmul.mubr.f32.vlgmr.msra.gmra.mrb[8].mxu0 %v1920_v0  ;;  %1762 = vmatpush3.bf16.msra.mxu1 %v2029_v12 }
  0x2b   :  { %1765 = vmatpush3.bf16.msra.mxu0 %v2018_v8  ;;  %1693 = vmatprep.mubr.msk.f32.mxu0 %vm1921_vm0, %v1920_v0 }
  0x2c   :  { %1766 = vmatprep.subr.bf16.mxu0 %v1922_v9  ;;  %1769 = vmatprep.subr.bf16.mxu1 %v1922_v9 }
  0x2f   :  { %1768 = vmatpush3.bf16.msra.mxu0 %v2029_v12 }
  0x30   :  { %1775 = vmatprep.subr.bf16.mxu0 %v1922_v9 }
  0xe9   :  { %v115_v14 = vpop.f32.mrb[0].mxu0 }
  0xea   :  { %v116_v15 = vadd.f32 %v2046_v13, %v115_v14  ;;  %v1627_v16 = vpop.f32.mrb[1].mxu0 }
  0xec   :  { %119 = vst [vmem:[#allocation2] sm:$0x3] %v116_v15  ;;  %v191_v47 = vpop.f32.mrb[0].mxu1 }
  0xed   :  { %v268_v17 = vpop.f32.mrb[2].mxu0  ;;  %v192_v48 = vadd.f32 %v2046_v13, %v191_v47  ;;  %v1632_v49 = vpop.f32.mrb[1].mxu1 }
  0xee   :  { %v269_v18 = vadd.f32 %v2046_v13, %v268_v17  ;;  %v1637_v19 = vpop.f32.mrb[3].mxu0 }
  0xef   :  { %196 = vst [vmem:[#allocation2 + $0x2] sm:$0x3] %v192_v48 }
  0xf0   :  { %273 = vst [vmem:[#allocation2 + $0x4] sm:$0x3] %v269_v18  ;;  %v345_v50 = vpop.f32.mrb[2].mxu1 }
  0xf1   :  { %v422_v20 = vpop.f32.mrb[4].mxu0  ;;  %v346_v51 = vadd.f32 %v2046_v13, %v345_v50  ;;  %v1642_v52 = vpop.f32.mrb[3].mxu1 }
  0xf2   :  { %v423_v21 = vadd.f32 %v2046_v13, %v422_v20  ;;  %v1647_v22 = vpop.f32.mrb[5].mxu0 }
  0xf3   :  { %v663_v26 = vld [vmem:[#allocation2] sm:$0x3]  ;;  %350 = vst [vmem:[#allocation2 + $0x6] sm:$0x3] %v346_v51 }
  0xf4   :  { %427 = vst [vmem:[#allocation2 + $0x8] sm:$0x3] %v423_v21  ;;  %v499_v53 = vpop.f32.mrb[4].mxu1 }
  0xf5   :  { %v576_v23 = vpop.f32.mrb[6].mxu0  ;;  %v500_v54 = vadd.f32 %v2046_v13, %v499_v53  ;;  %v1652_v55 = vpop.f32.mrb[5].mxu1 }
  0xf6   :  { %v577_v24 = vadd.f32 %v2046_v13, %v576_v23  ;;  %v1657_v25 = vpop.f32.mrb[7].mxu0  ;;  %v769_v60 = vld [vmem:[#allocation2 + $0x2] sm:$0x3] }
  0xf7   :  { %504 = vst [vmem:[#allocation2 + $0xa] sm:$0x3] %v500_v54  ;;  %v873_v18 = vld [vmem:[#allocation2 + $0x4] sm:$0x3] }
  0xf8   :  { %581 = vst [vmem:[#allocation2 + $0xc] sm:$0x3] %v577_v24  ;;  %v653_v56 = vpop.f32.mrb[6].mxu1 }
  0xf9   :  { %v654_v57 = vadd.f32 %v2046_v13, %v653_v56  ;;  %v1662_v58 = vpop.f32.mrb[7].mxu1 }
  0xfb   :  { %658 = vst [vmem:[#allocation2 + $0xe] sm:$0x3] %v654_v57  ;;  %v1081_v54 = vld [vmem:[#allocation2 + $0x8] sm:$0x3] }
  0xfd   :  { %v734_v27 = vpop.f32.mrb[8].mxu0 }
  0xfe   :  { %v738_v28 = vadd.f32 %v734_v27, %v663_v26  ;;  %v1673_v29 = vpop.f32.mrb[9].mxu0 }
 0x100   :  { %1807 = vtanh.f32 %v738_v28  ;;  %v1545_v31 = vmul.f32 -1.442695, %v738_v28 }
 0x102   :  { %1809 = vpow2.f32 %v1545_v31 }
 0x10a   :  { %v1808_v30 = vpop.eup %1807 }
 0x10b   :  { %748 = vrot.lane.b32.xlu0 %v1808_v30, %s1923_s3 }
 0x10c   :  { %v1810_v32 = vpop.eup %1809 }
 0x10d   :  { %v742_v33 = vadd.f32 1.0, %v1810_v32 }
 0x10f   :  { %1811 = vrcp.f32 %v742_v33 }
 0x119   :  { %v1812_v34 = vpop.eup %1811 }
 0x11a   :  { %v746_v37 = vmul.f32 0.0, %v1812_v34 }
 0x17d   :  { %v749_v35 = vpop.permute.xlu0 %748 }
 0x17e   :  { %v751_v36 = vmul.f32 %v1812_v34, %v749_v35 }
 0x180   :  { %753 = vrot.lane.b32.xlu0 %v751_v36, %s1924_s21  ;;  %v977_v36 = vld [vmem:[#allocation2 + $0x6] sm:$0x3] }
 0x1f2   :  { %v754_v38 = vpop.permute.xlu0 %753 }
 0x1f3   :  { %v2054_v39 = vadd.f32 %v754_v38, %v746_v37 }
 0x1f5   :  { %1813 = vtanh.f32 %v2054_v39 }
 0x1ff   :  { %v1814_v43 = vpop.eup %1813 }
 0x200   :  { %759 = vrot.lane.b32.xlu1 %v1814_v43, %s1923_s3 }
 0x272   :  { %v760_v45 = vpop.permute.xlu1 %759 }
 0x273   :  { %v762_v46 = vmul.f32 %v1812_v34, %v760_v45 }
 0x275   :  { %764 = vrot.lane.b32.xlu1 %v762_v46, %s1924_s21 }
 0x2e7   :  { %v765_v59 = vpop.permute.xlu1 %764 }
 0x2e8   :  { %768 = vst.msk [vmem:[%s2213_s4] sm:$0x3] %vm767_vm3, %v765_v59  ;;  %1683 = vmatmul.mubr.msk.f32.vlgmr.msra.gmra.mrb[8].mxu1 %vm664_vm4, %v765_v59 }
 0x2e9   :  { %1771 = vmatpush3.bf16.msra.mxu1 %v2018_v8  ;;  %1704 = vmatprep.mubr.msk.f32.mxu1 %vm1921_vm0, %v1920_v0 }
 0x2ea   :  { %1772 = vmatprep.subr.bf16.mxu1 %v1922_v9 }
 0x2ed   :  { %1774 = vmatpush3.bf16.msra.mxu1 %v2029_v12 }
 0x2ee   :  { %1781 = vmatprep.subr.bf16.mxu1 %v1922_v9 }
 0x3bb   :  { %v838_v61 = vpop.f32.mrb[8].mxu1 }
 0x3bc   :  { %v842_v62 = vadd.f32 %v838_v61, %v769_v60  ;;  %v1684_v63 = vpop.f32.mrb[9].mxu1 }
 0x3be   :  { %1815 = vtanh.f32 %v842_v62  ;;  %v1547_v2 = vmul.f32 -1.442695, %v842_v62 }
 0x3c0   :  { %1817 = vpow2.f32 %v1547_v2 }
 0x3c8   :  { %v1816_v1 = vpop.eup %1815 }
 0x3c9   :  { %852 = vrot.lane.b32.xlu0 %v1816_v1, %s1923_s3 }
 0x3ca   :  { %v1818_v3 = vpop.eup %1817 }
 0x3cb   :  { %v846_v4 = vadd.f32 1.0, %v1818_v3 }
 0x3cd   :  { %1819 = vrcp.f32 %v846_v4 }
 0x3d7   :  { %v1820_v5 = vpop.eup %1819 }
 0x3d8   :  { %v850_v10 = vmul.f32 %v1820_v5, %v2054_v39 }
 0x43b   :  { %v853_v6 = vpop.permute.xlu0 %852 }
 0x43c   :  { %v855_v7 = vmul.f32 %v1820_v5, %v853_v6 }
 0x43e   :  { %857 = vrot.lane.b32.xlu1 %v855_v7, %s1924_s21 }
 0x4b0   :  { %v858_v11 = vpop.permute.xlu1 %857 }
 0x4b1   :  { %v860_v13 = vadd.f32 %v858_v11, %v850_v10  ;;  %v1185_v11 = vld [vmem:[#allocation2 + $0xa] sm:$0x3] }
 0x4b3   :  { %1821 = vtanh.f32 %v860_v13 }
 0x4bd   :  { %v1822_v14 = vpop.eup %1821 }
 0x4be   :  { %863 = vrot.lane.b32.xlu0 %v1822_v14, %s1923_s3 }
 0x530   :  { %v864_v15 = vpop.permute.xlu0 %863 }
 0x531   :  { %v866_v16 = vmul.f32 %v1820_v5, %v864_v15 }
 0x533   :  { %868 = vrot.lane.b32.xlu1 %v866_v16, %s1924_s21 }
 0x5a5   :  { %v869_v17 = vpop.permute.xlu1 %868 }
 0x5a6   :  { %1548 = vst.msk [vmem:[%s2213_s4 + $0x2] sm:$0x3] %vm767_vm3, %v869_v17  ;;  %1694 = vmatmul.mubr.msk.f32.vlgmr.msra.gmra.mrb[10].mxu0 %vm664_vm4, %v869_v17 }
 0x5a7   :  { %1777 = vmatpush3.bf16.msra.mxu0 %v2018_v8  ;;  %1715 = vmatprep.mubr.msk.f32.mxu0 %vm1921_vm0, %v1920_v0 }
 0x5a8   :  { %1778 = vmatprep.subr.bf16.mxu0 %v1922_v9 }
 0x5ab   :  { %1780 = vmatpush3.bf16.msra.mxu0 %v2029_v12 }
 0x5ac   :  { %1787 = vmatprep.subr.bf16.mxu0 %v1922_v9 }
 0x679   :  { %v942_v19 = vpop.f32.mrb[10].mxu0 }
 0x67a   :  { %v946_v20 = vadd.f32 %v942_v19, %v873_v18  ;;  %v1695_v21 = vpop.f32.mrb[11].mxu0 }
 0x67c   :  { %1823 = vtanh.f32 %v946_v20  ;;  %v1550_v23 = vmul.f32 -1.442695, %v946_v20 }
 0x67e   :  { %1825 = vpow2.f32 %v1550_v23 }
 0x686   :  { %v1824_v22 = vpop.eup %1823 }
 0x687   :  { %956 = vrot.lane.b32.xlu0 %v1824_v22, %s1923_s3 }
 0x688   :  { %v1826_v24 = vpop.eup %1825 }
 0x689   :  { %v950_v25 = vadd.f32 1.0, %v1826_v24 }
 0x68b   :  { %1827 = vrcp.f32 %v950_v25 }
 0x695   :  { %v1828_v26 = vpop.eup %1827 }
 0x696   :  { %v954_v29 = vmul.f32 %v1828_v26, %v860_v13 }
 0x6f9   :  { %v957_v27 = vpop.permute.xlu0 %956 }
 0x6fa   :  { %v959_v28 = vmul.f32 %v1828_v26, %v957_v27 }
 0x6fc   :  { %961 = vrot.lane.b32.xlu1 %v959_v28, %s1924_s21 }
 0x76e   :  { %v962_v30 = vpop.permute.xlu1 %961 }
 0x76f   :  { %v964_v31 = vadd.f32 %v962_v30, %v954_v29 }
 0x771   :  { %1829 = vtanh.f32 %v964_v31 }
 0x77b   :  { %v1830_v32 = vpop.eup %1829 }
 0x77c   :  { %967 = vrot.lane.b32.xlu0 %v1830_v32, %s1923_s3 }
 0x7ee   :  { %v968_v33 = vpop.permute.xlu0 %967 }
 0x7ef   :  { %v970_v34 = vmul.f32 %v1828_v26, %v968_v33  ;;  %v1289_v26 = vld [vmem:[#allocation2 + $0xc] sm:$0x3] }
 0x7f1   :  { %972 = vrot.lane.b32.xlu1 %v970_v34, %s1924_s21 }
 0x863   :  { %v973_v35 = vpop.permute.xlu1 %972 }
 0x864   :  { %1551 = vst.msk [vmem:[%s2213_s4 + $0x4] sm:$0x3] %vm767_vm3, %v973_v35  ;;  %1705 = vmatmul.mubr.msk.f32.vlgmr.msra.gmra.mrb[10].mxu1 %vm664_vm4, %v973_v35 }
 0x865   :  { %1783 = vmatpush3.bf16.msra.mxu1 %v2018_v8  ;;  %1726 = vmatprep.mubr.msk.f32.mxu1 %vm1921_vm0, %v1920_v0 }
 0x866   :  { %1784 = vmatprep.subr.bf16.mxu1 %v1922_v9 }
 0x869   :  { %1786 = vmatpush3.bf16.msra.mxu1 %v2029_v12 }
 0x86a   :  { %1793 = vmatprep.subr.bf16.mxu1 %v1922_v9 }
 0x937   :  { %v1046_v37 = vpop.f32.mrb[10].mxu1 }
 0x938   :  { %v1050_v38 = vadd.f32 %v1046_v37, %v977_v36  ;;  %v1706_v39 = vpop.f32.mrb[11].mxu1 }
 0x93a   :  { %1831 = vtanh.f32 %v1050_v38  ;;  %v1553_v41 = vmul.f32 -1.442695, %v1050_v38 }
 0x93c   :  { %1833 = vpow2.f32 %v1553_v41 }
 0x944   :  { %v1832_v40 = vpop.eup %1831 }
 0x945   :  { %1060 = vrot.lane.b32.xlu0 %v1832_v40, %s1923_s3 }
 0x946   :  { %v1834_v42 = vpop.eup %1833 }
 0x947   :  { %v1054_v43 = vadd.f32 1.0, %v1834_v42 }
 0x949   :  { %1835 = vrcp.f32 %v1054_v43 }
 0x953   :  { %v1836_v44 = vpop.eup %1835 }
 0x954   :  { %v1058_v47 = vmul.f32 %v1836_v44, %v964_v31 }
 0x9b7   :  { %v1061_v45 = vpop.permute.xlu0 %1060 }
 0x9b8   :  { %v1063_v46 = vmul.f32 %v1836_v44, %v1061_v45 }
 0x9ba   :  { %1065 = vrot.lane.b32.xlu1 %v1063_v46, %s1924_s21 }
 0xa2c   :  { %v1066_v48 = vpop.permute.xlu1 %1065 }
 0xa2d   :  { %v1068_v49 = vadd.f32 %v1066_v48, %v1058_v47 }
 0xa2f   :  { %1837 = vtanh.f32 %v1068_v49 }
 0xa39   :  { %v1838_v50 = vpop.eup %1837 }
 0xa3a   :  { %1071 = vrot.lane.b32.xlu0 %v1838_v50, %s1923_s3 }
 0xaac   :  { %v1072_v51 = vpop.permute.xlu0 %1071 }
 0xaad   :  { %v1074_v52 = vmul.f32 %v1836_v44, %v1072_v51  ;;  %v1393_v44 = vld [vmem:[#allocation2 + $0xe] sm:$0x3] }
 0xaaf   :  { %1076 = vrot.lane.b32.xlu1 %v1074_v52, %s1924_s21 }
 0xb21   :  { %v1077_v53 = vpop.permute.xlu1 %1076 }
 0xb22   :  { %1554 = vst.msk [vmem:[%s2213_s4 + $0x6] sm:$0x3] %vm767_vm3, %v1077_v53  ;;  %1716 = vmatmul.mubr.msk.f32.vlgmr.msra.gmra.mrb[12].mxu0 %vm664_vm4, %v1077_v53 }
 0xb23   :  { %1789 = vmatpush3.bf16.msra.mxu0 %v2018_v8  ;;  %1737 = vmatprep.mubr.msk.f32.mxu0 %vm1921_vm0, %v1920_v0 }
 0xb24   :  { %1790 = vmatprep.subr.bf16.mxu0 %v1922_v9 }
 0xb27   :  { %1792 = vmatpush3.bf16.msra.mxu0 %v2029_v12 }
 0xbf5   :  { %v1150_v55 = vpop.f32.mrb[12].mxu0 }
 0xbf6   :  { %v1154_v56 = vadd.f32 %v1150_v55, %v1081_v54  ;;  %v1717_v57 = vpop.f32.mrb[13].mxu0 }
 0xbf8   :  { %1839 = vtanh.f32 %v1154_v56  ;;  %v1556_v59 = vmul.f32 -1.442695, %v1154_v56 }
 0xbfa   :  { %1841 = vpow2.f32 %v1556_v59 }
 0xc02   :  { %v1840_v58 = vpop.eup %1839 }
 0xc03   :  { %1164 = vrot.lane.b32.xlu0 %v1840_v58, %s1923_s3 }
 0xc04   :  { %v1842_v60 = vpop.eup %1841 }
 0xc05   :  { %v1158_v61 = vadd.f32 1.0, %v1842_v60 }
 0xc07   :  { %1843 = vrcp.f32 %v1158_v61 }
 0xc11   :  { %v1844_v62 = vpop.eup %1843 }
 0xc12   :  { %v1162_v2 = vmul.f32 %v1844_v62, %v1068_v49 }
 0xc75   :  { %v1165_v63 = vpop.permute.xlu0 %1164 }
 0xc76   :  { %v1167_v1 = vmul.f32 %v1844_v62, %v1165_v63 }
 0xc78   :  { %1169 = vrot.lane.b32.xlu1 %v1167_v1, %s1924_s21 }
 0xcea   :  { %v1170_v3 = vpop.permute.xlu1 %1169 }
 0xceb   :  { %v1172_v4 = vadd.f32 %v1170_v3, %v1162_v2 }
 0xced   :  { %1845 = vtanh.f32 %v1172_v4 }
 0xcf7   :  { %v1846_v5 = vpop.eup %1845 }
 0xcf8   :  { %1175 = vrot.lane.b32.xlu0 %v1846_v5, %s1923_s3 }
 0xd6a   :  { %v1176_v6 = vpop.permute.xlu0 %1175 }
 0xd6b   :  { %v1178_v7 = vmul.f32 %v1844_v62, %v1176_v6 }
 0xd6d   :  { %1180 = vrot.lane.b32.xlu1 %v1178_v7, %s1924_s21 }
 0xddf   :  { %v1181_v10 = vpop.permute.xlu1 %1180 }
 0xde0   :  { %1557 = vst.msk [vmem:[%s2213_s4 + $0x8] sm:$0x3] %vm767_vm3, %v1181_v10  ;;  %1727 = vmatmul.mubr.msk.f32.vlgmr.msra.gmra.mrb[12].mxu1 %vm664_vm4, %v1181_v10 }
 0xde1   :  { %1795 = vmatpush3.bf16.msra.mxu1 %v2018_v8  ;;  %1748 = vmatprep.mubr.msk.f32.mxu1 %vm1921_vm0, %v1920_v0 }
 0xde2   :  { %1796 = vmatprep.subr.bf16.mxu1 %v1922_v9 }
 0xde5   :  { %1798 = vmatpush3.bf16.msra.mxu1 %v2029_v12 }
 0xeb3   :  { %v1254_v13 = vpop.f32.mrb[12].mxu1 }
 0xeb4   :  { %v1258_v14 = vadd.f32 %v1254_v13, %v1185_v11  ;;  %v1728_v15 = vpop.f32.mrb[13].mxu1 }
 0xeb6   :  { %1847 = vtanh.f32 %v1258_v14  ;;  %v1559_v17 = vmul.f32 -1.442695, %v1258_v14 }
 0xeb8   :  { %1849 = vpow2.f32 %v1559_v17 }
 0xec0   :  { %v1848_v16 = vpop.eup %1847 }
 0xec1   :  { %1268 = vrot.lane.b32.xlu0 %v1848_v16, %s1923_s3 }
 0xec2   :  { %v1850_v18 = vpop.eup %1849 }
 0xec3   :  { %v1262_v19 = vadd.f32 1.0, %v1850_v18 }
 0xec5   :  { %1851 = vrcp.f32 %v1262_v19 }
 0xecf   :  { %v1852_v8 = vpop.eup %1851 }
 0xed0   :  { %v1266_v9 = vmul.f32 %v1852_v8, %v1172_v4 }
 0xf33   :  { %v1269_v20 = vpop.permute.xlu0 %1268 }
 0xf34   :  { %v1271_v0 = vmul.f32 %v1852_v8, %v1269_v20 }
 0xf36   :  { %1273 = vrot.lane.b32.xlu1 %v1271_v0, %s1924_s21 }
 0xfa8   :  { %v1274_v12 = vpop.permute.xlu1 %1273 }
 0xfa9   :  { %v1276_v21 = vadd.f32 %v1274_v12, %v1266_v9 }
 0xfab   :  { %1853 = vtanh.f32 %v1276_v21 }
 0xfb5   :  { %v1854_v22 = vpop.eup %1853 }
 0xfb6   :  { %1279 = vrot.lane.b32.xlu0 %v1854_v22, %s1923_s3 }
0x1028   :  { %v1280_v23 = vpop.permute.xlu0 %1279 }
0x1029   :  { %v1282_v24 = vmul.f32 %v1852_v8, %v1280_v23 }
0x102b   :  { %1284 = vrot.lane.b32.xlu1 %v1282_v24, %s1924_s21 }
0x109d   :  { %v1285_v25 = vpop.permute.xlu1 %1284 }
0x109e   :  { %1560 = vst.msk [vmem:[%s2213_s4 + $0xa] sm:$0x3] %vm767_vm3, %v1285_v25  ;;  %1738 = vmatmul.mubr.msk.f32.vlgmr.msra.gmra.mrb[14].mxu0 %vm664_vm4, %v1285_v25 }
0x1171   :  { %v1358_v27 = vpop.f32.mrb[14].mxu0 }
0x1172   :  { %v1362_v28 = vadd.f32 %v1358_v27, %v1289_v26  ;;  %v1739_v29 = vpop.f32.mrb[15].mxu0 }
0x1174   :  { %1855 = vtanh.f32 %v1362_v28  ;;  %v1562_v31 = vmul.f32 -1.442695, %v1362_v28 }
0x1176   :  { %1857 = vpow2.f32 %v1562_v31 }
0x117e   :  { %v1856_v30 = vpop.eup %1855 }
0x117f   :  { %1372 = vrot.lane.b32.xlu0 %v1856_v30, %s1923_s3 }
0x1180   :  { %v1858_v32 = vpop.eup %1857 }
0x1181   :  { %v1366_v33 = vadd.f32 1.0, %v1858_v32 }
0x1183   :  { %1859 = vrcp.f32 %v1366_v33 }
0x118d   :  { %v1860_v34 = vpop.eup %1859 }
0x118e   :  { %v1370_v37 = vmul.f32 %v1860_v34, %v1276_v21 }
0x11f1   :  { %v1373_v35 = vpop.permute.xlu0 %1372 }
0x11f2   :  { %v1375_v36 = vmul.f32 %v1860_v34, %v1373_v35 }
0x11f4   :  { %1377 = vrot.lane.b32.xlu1 %v1375_v36, %s1924_s21 }
0x1266   :  { %v1378_v38 = vpop.permute.xlu1 %1377 }
0x1267   :  { %v1380_v39 = vadd.f32 %v1378_v38, %v1370_v37 }
0x1269   :  { %1861 = vtanh.f32 %v1380_v39 }
0x1273   :  { %v1862_v40 = vpop.eup %1861 }
0x1274   :  { %1383 = vrot.lane.b32.xlu0 %v1862_v40, %s1923_s3 }
0x12e6   :  { %v1384_v41 = vpop.permute.xlu0 %1383 }
0x12e7   :  { %v1386_v42 = vmul.f32 %v1860_v34, %v1384_v41 }
0x12e9   :  { %1388 = vrot.lane.b32.xlu1 %v1386_v42, %s1924_s21 }
0x135b   :  { %v1389_v43 = vpop.permute.xlu1 %1388 }
0x135c   :  { %1563 = vst.msk [vmem:[%s2213_s4 + $0xc] sm:$0x3] %vm767_vm3, %v1389_v43  ;;  %1749 = vmatmul.mubr.msk.f32.vlgmr.msra.gmra.mrb[14].mxu1 %vm664_vm4, %v1389_v43 }
0x142f   :  { %v1462_v45 = vpop.f32.mrb[14].mxu1 }
0x1430   :  { %v1466_v46 = vadd.f32 %v1462_v45, %v1393_v44  ;;  %v1750_v47 = vpop.f32.mrb[15].mxu1 }
0x1432   :  { %1863 = vtanh.f32 %v1466_v46  ;;  %v1565_v49 = vmul.f32 -1.442695, %v1466_v46 }
0x1434   :  { %1865 = vpow2.f32 %v1565_v49 }
0x143c   :  { %v1864_v48 = vpop.eup %1863 }
0x143d   :  { %1476 = vrot.lane.b32.xlu0 %v1864_v48, %s1923_s3 }
0x143e   :  { %v1866_v50 = vpop.eup %1865 }
0x143f   :  { %v1470_v51 = vadd.f32 1.0, %v1866_v50 }
0x1441   :  { %1867 = vrcp.f32 %v1470_v51 }
0x144b   :  { %v1868_v52 = vpop.eup %1867 }
0x144c   :  { %v1474_v55 = vmul.f32 %v1868_v52, %v1380_v39 }
0x14af   :  { %v1477_v53 = vpop.permute.xlu0 %1476 }
0x14b0   :  { %v1479_v54 = vmul.f32 %v1868_v52, %v1477_v53 }
0x14b2   :  { %1481 = vrot.lane.b32.xlu1 %v1479_v54, %s1924_s21 }
0x1524   :  { %v1482_v56 = vpop.permute.xlu1 %1481 }
0x1525   :  { %v1484_v57 = vadd.f32 %v1482_v56, %v1474_v55 }
0x1527   :  { %1869 = vtanh.f32 %v1484_v57  ;;  %1498 = vrot.lane.b32.xlu1 %v1484_v57, %s1925_s17 }
0x1531   :  { %v1870_v58 = vpop.eup %1869 }
0x1532   :  { %1487 = vrot.lane.b32.xlu0 %v1870_v58, %s1923_s3 }
0x1599   :  { %v1499_v59 = vpop.permute.xlu1 %1498 }
0x159a   :  { %1501 = vst.msk [vmem:[#allocation6] sm:$0x3] %vm767_vm3, %v1499_v59 }
0x159b   :  { %1904 = shalt.err (!%p1901_p12)
}
0x159c   :  { %s1905_s23 = scalar_lea.hbm %s2214_s5, 32 }
0x159d   :  { %p1906_p13 = scmp.ne.s32.totalorder %s2214_s5, %s1905_s23  ;;  %p1909_p0 = scmp.lt.u32.totalorder %s1905_s23, %s2214_s5 }
0x159f   :  { %p1911_p1 = pnand %p1909_p0, %p1906_p13 }
0x15a1   :  { %1914 = shalt.err (!%p1911_p1)
}
0x15a2   :  { %1513 = dma.vmem_to_hbm [thread:$0]  %s1511_s19, 32, %s2214_s5, [#allocation5]  }
0x15a4   :  { %v1488_v60 = vpop.permute.xlu0 %1487 }
0x15a5   :  { %v1490_v61 = vmul.f32 %v1868_v52, %v1488_v60 }
0x15a7   :  { %1492 = vrot.lane.b32.xlu0 %v1490_v61, %s1924_s21 }
0x1619   :  { %v1493_v62 = vpop.permute.xlu0 %1492 }
0x161a   :  { %1566 = vst.msk [vmem:[%s2213_s4 + $0xe] sm:$0x3] %vm767_vm3, %v1493_v62 }
0x161b   :  { %1917 = dma.done.wait [#allocation5], 32  }
0x161c   :  { %1918 = vsyncadd [#allocation5], 4294967264 }
0x161d   :  { %1519 = vsyncpa [#allocation4], 1 }
0x161e   :  { %1520 = vsyncpa [#allocation5], 1 }

</bundles_post_ra>
